<compile_context>
chip_gen: v7x
topology: tpu7x:2x2x1
jax: 0.10.0
libtpu: 0.0.40
codegen_flags: <defaults>
</compile_context>

<pallas_src>
from functools import partial

import jax
import jax.numpy as jnp
from jax import lax
from jax.experimental import pallas as pl
from jax.experimental.pallas import tpu as pltpu


def _lstm_recurrence_kernel(xg_ref, w_ref, h_out_ref, h_scr, c_scr):
    """One (batch-block, time-block) grid step of the LSTM recurrence.

    xg_ref   : (Ts, Bb, 4H) precomputed x @ W_ih^T + (b_ih + b_hh), gates (i,f,g,o)
    w_ref    : (4H, 4H)     recurrent weight: rows [0:H] = W_hh^T, rows [H:] = 0
    h_out_ref: (Bb, 4H)     final hidden state (valid in lanes [0:H])
    h_scr, c_scr : (Bb, 4H) f32 carries, persist across time grid steps
    """
    t_blk = pl.program_id(1)
    ts, bb, g4 = xg_ref.shape
    hd = g4 // 4

    @pl.when(t_blk == 0)
    def _init():
        h_scr[...] = jnp.zeros_like(h_scr)
        c_scr[...] = jnp.zeros_like(c_scr)

    w = w_ref[...]  # resident weight load hoisted out of the time loop

    # Loop-invariant lane mask selecting the tanh gate block g = lanes [2H, 3H).
    lane = lax.broadcasted_iota(jnp.int32, (bb, g4), 1)
    g_mask = (lane >= 2 * hd) & (lane < 3 * hd)

    def step(tt, carry):
        h, c = carry  # f32 (Bb, 4H); lanes [0:H) hold the true state
        # Recurrent dot: don't-care lanes of h hit exactly-zero weight rows.
        gates = xg_ref[tt].astype(jnp.float32) + jnp.dot(
            h.astype(w.dtype), w, preferred_element_type=jnp.float32)
        sig = jax.nn.sigmoid(gates)           # one full-width EUP pass
        th = jnp.tanh(gates)                  # one full-width EUP pass
        act = jnp.where(g_mask, th, sig)      # lanes: [ i | f | g | o ] activated
        f_al = pltpu.roll(act, 3 * hd, 1)     # f -> lanes [0:H)   (XLU rotate)
        g_al = pltpu.roll(act, 2 * hd, 1)     # g -> lanes [0:H)
        o_al = pltpu.roll(act, 1 * hd, 1)     # o -> lanes [0:H)
        c_new = f_al * c + act * g_al         # i is act at lanes [0:H)
        h_new = o_al * jnp.tanh(c_new)        # third full-width EUP pass
        return h_new, c_new

    # TODO(synk): at tiny Bb*H the (Bb,4H)@(4H,4H) dot underfills the MXU rows;
    # compare against a VPU broadcast-MAC recurrence when batch stays small.
    h_fin, c_fin = lax.fori_loop(0, ts, step, (h_scr[...], c_scr[...]),
                                 unroll=min(ts, 8))
    h_scr[...] = h_fin
    c_scr[...] = c_fin

    @pl.when(t_blk == pl.num_programs(1) - 1)
    def _finalize():
        h_out_ref[...] = h_fin


def _round_up(x, m):
    return ((x + m - 1) // m) * m


@partial(jax.jit, static_argnames=("time_block", "batch_block", "param_dtype"))
def lstm_classifier_forward(sentence, emb_table, w_ih, w_hh, b_ih, b_hh,
                            w_out, b_out, *, time_block=8, batch_block=128,
                            param_dtype=jnp.float32):
    """sentence: (S, B) int32 token ids.  Returns logits (B, articles_num)."""
    S, B = sentence.shape
    H = w_hh.shape[1]
    G = 4 * H

    # Batch padding / blocking (sublane multiple of 8).
    Bb = min(_round_up(B, 8), _round_up(batch_block, 8))
    Bp = _round_up(B, Bb)
    # Time blocking: largest divisor of S not exceeding time_block.
    Ts = max(1, min(time_block, S))
    while S % Ts:
        Ts -= 1

    # ---- XLA glue: embedding gather + hoisted input projection (single-use) ----
    x = jnp.take(emb_table, sentence, axis=0).astype(jnp.float32)          # (S, B, E)
    xg = jnp.einsum('sbe,ge->sbg', x, w_ih.astype(jnp.float32)) + (b_ih + b_hh)
    xg = jnp.pad(xg, ((0, 0), (0, Bp - B), (0, 0))).astype(param_dtype)    # (S, Bp, 4H)

    # Recurrent weight, pre-transposed and zero-padded to (4H, 4H): rows [0:H]
    # hold W_hh^T, the rest are exactly zero (keeps h full-width in the kernel).
    w_pad = jnp.zeros((G, G), param_dtype).at[:H, :].set(
        jnp.transpose(w_hh).astype(param_dtype))

    nb, nt = Bp // Bb, S // Ts
    grid_spec = pltpu.PrefetchScalarGridSpec(
        num_scalar_prefetch=0,
        grid=(nb, nt),  # (batch blocks: parallel, time blocks: arbitrary)
        in_specs=[
            # xg streams in (Ts, Bb, 4H) chunks; pipeline double-buffers it so
            # the DMA of block t+1 overlaps the recurrence over block t.
            pl.BlockSpec((Ts, Bb, G), lambda b, t: (t, b, 0)),
            # Constant block index -> fetched once, kept resident across steps.
            pl.BlockSpec((G, G), lambda b, t: (0, 0)),
        ],
        out_specs=pl.BlockSpec((Bb, G), lambda b, t: (b, 0)),  # lane-dense (128-wide)
        scratch_shapes=[pltpu.VMEM((Bb, G), jnp.float32),      # h carry
                        pltpu.VMEM((Bb, G), jnp.float32)],     # c carry
    )

    h_full = pl.pallas_call(
        _lstm_recurrence_kernel,
        out_shape=jax.ShapeDtypeStruct((Bp, G), jnp.float32),
        grid_spec=grid_spec,
        compiler_params=pltpu.CompilerParams(
            dimension_semantics=("parallel", "arbitrary"),
            vmem_limit_bytes=int(32 * 2**20)),
    )(xg, w_pad)

    # Classifier projection is used once -> plain XLA matmul on h_n[-1].
    h_n = h_full[:B, :H]
    return h_n @ w_out.T + b_out


# ----------------------- pure-JAX reference for sanity -----------------------
def reference_forward(sentence, emb_table, w_ih, w_hh, b_ih, b_hh, w_out, b_out):
    x = jnp.take(emb_table, sentence, axis=0)   # (S, B, E)
    H = w_hh.shape[1]
    B = sentence.shape[1]
    h = jnp.zeros((B, H), jnp.float32)
    c = jnp.zeros((B, H), jnp.float32)
    for t in range(sentence.shape[0]):
        gates = x[t] @ w_ih.T + h @ w_hh.T + b_ih + b_hh
        i = jax.nn.sigmoid(gates[:, 0 * H:1 * H])
        f = jax.nn.sigmoid(gates[:, 1 * H:2 * H])
        g = jnp.tanh(gates[:, 2 * H:3 * H])
        o = jax.nn.sigmoid(gates[:, 3 * H:4 * H])
        c = f * c + i * g
        h = o * jnp.tanh(c)
    return h @ w_out.T + b_out


if __name__ == "__main__":
    # args: embedding_dim=16, hidden_dim=32, articles_num=8, batch_size=2, seq=8
    VOCAB, E, H, A = 100, 16, 32, 8
    S, B = 8, 2

    key = jax.random.PRNGKey(0)
    ks = jax.random.split(key, 8)

    emb_table = jax.random.normal(ks[0], (VOCAB, E), jnp.float32)
    bound = 1.0 / jnp.sqrt(H)
    w_ih = jax.random.uniform(ks[1], (4 * H, E), jnp.float32, -bound, bound)
    w_hh = jax.random.uniform(ks[2], (4 * H, H), jnp.float32, -bound, bound)
    b_ih = jax.random.uniform(ks[3], (4 * H,), jnp.float32, -bound, bound)
    b_hh = jax.random.uniform(ks[4], (4 * H,), jnp.float32, -bound, bound)
    w_out = jax.random.uniform(ks[5], (A, H), jnp.float32, -bound, bound)
    b_out = jax.random.uniform(ks[6], (A,), jnp.float32, -bound, bound)

    sentence = jax.random.randint(ks[7], (S, B), 0, VOCAB, jnp.int32)

    y_ref = reference_forward(sentence, emb_table, w_ih, w_hh,
                              b_ih, b_hh, w_out, b_out)

    # f32 storage path; time_block=4 -> grid=(1, 2), exercising the carry of
    # h/c across time grid steps.
    y32 = lstm_classifier_forward(sentence, emb_table, w_ih, w_hh,
                                  b_ih, b_hh, w_out, b_out,
                                  time_block=4, param_dtype=jnp.float32)
    y32 = jax.block_until_ready(y32)
    assert y32.shape == (B, A)
    assert jnp.allclose(y32, y_ref, atol=1e-3, rtol=1e-3), "f32 mismatch vs ref"

    # bf16-storage path (bf16 xg / W_hh, f32 accumulation + f32 cell math);
    # looser tolerance against the f32 reference.
    y16 = lstm_classifier_forward(sentence, emb_table, w_ih, w_hh,
                                  b_ih, b_hh, w_out, b_out,
                                  time_block=4, param_dtype=jnp.bfloat16)
    y16 = jax.block_until_ready(y16)
    assert y16.shape == (B, A)
    assert jnp.allclose(y16, y_ref, atol=1e-1, rtol=1e-1), "bf16 mismatch vs ref"

    print("KERNEL_OK")
</pallas_src>

<mosaic_0001>
module attributes {stable_mosaic.version = 11 : i64} {
  func.func @_lstm_recurrence_kernel(%arg0: i32, %arg1: i32, %arg2: memref<4x8x128xf32, #tpu.memory_space<vmem>>, %arg3: memref<128x128xf32, #tpu.memory_space<vmem>>, %arg4: memref<8x128xf32, #tpu.memory_space<vmem>>, %arg5: memref<8x128xf32, #tpu.memory_space<vmem>>, %arg6: memref<8x128xf32, #tpu.memory_space<vmem>>) attributes {dimension_semantics = [#tpu.dimension_semantics<parallel>, #tpu.dimension_semantics<arbitrary>], iteration_bounds = array<i64: 1, 2>, scalar_prefetch = 0 : i64, scratch_operands = 2 : i64, tpu.core_type = #tpu.core_type<tc>, window_params = [{transform_indices = @transform_0, window_bounds = array<i64: 4, 8, 128>}, {pipeline_mode = #tpu.pipeline_mode<synchronous>, transform_indices = @transform_1, window_bounds = array<i64: 128, 128>}, {transform_indices = @transform_2, window_bounds = array<i64: 8, 128>}]} {
    %c0_i32 = arith.constant 0 : i32
    %0 = arith.cmpi eq, %arg1, %c0_i32 : i32
    %1 = arith.extui %0 : i1 to i32
    %c0_i32_0 = arith.constant 0 : i32
    %2 = arith.cmpi ne, %1, %c0_i32_0 : i32
    scf.if %2 {
      %cst_39 = arith.constant 0.000000e+00 : f32
      %97 = vector.broadcast %cst_39 : f32 to vector<8x128xf32>
      %c0_40 = arith.constant 0 : index
      %c0_41 = arith.constant 0 : index
      %98 = vector.load %arg5[%c0_40, %c0_41] : memref<8x128xf32, #tpu.memory_space<vmem>>, vector<8x128xf32>
      tpu.vector_store %arg5[%c0_40, %c0_41], %97 {strides = array<i32>} : memref<8x128xf32, #tpu.memory_space<vmem>>, vector<8x128xf32>,
      %cst_42 = arith.constant 0.000000e+00 : f32
      %99 = vector.broadcast %cst_42 : f32 to vector<8x128xf32>
      %c0_43 = arith.constant 0 : index
      %c0_44 = arith.constant 0 : index
      %100 = vector.load %arg6[%c0_43, %c0_44] : memref<8x128xf32, #tpu.memory_space<vmem>>, vector<8x128xf32>
      tpu.vector_store %arg6[%c0_43, %c0_44], %99 {strides = array<i32>} : memref<8x128xf32, #tpu.memory_space<vmem>>, vector<8x128xf32>,
    } else {
    }
    %c0 = arith.constant 0 : index
    %c0_1 = arith.constant 0 : index
    %3 = vector.load %arg3[%c0, %c0_1] : memref<128x128xf32, #tpu.memory_space<vmem>>, vector<128x128xf32>
    %4 = tpu.iota {dimensions = array<i32: 1>} : vector<8x128xi32>
    %c64_i32 = arith.constant 64 : i32
    %5 = vector.broadcast %c64_i32 : i32 to vector<8x128xi32>
    %6 = arith.cmpi sge, %4, %5 : vector<8x128xi32>
    %c96_i32 = arith.constant 96 : i32
    %7 = vector.broadcast %c96_i32 : i32 to vector<8x128xi32>
    %8 = arith.cmpi slt, %4, %7 : vector<8x128xi32>
    %9 = arith.andi %6, %8 : vector<8x128xi1>
    %c0_2 = arith.constant 0 : index
    %c0_3 = arith.constant 0 : index
    %10 = vector.load %arg5[%c0_2, %c0_3] : memref<8x128xf32, #tpu.memory_space<vmem>>, vector<8x128xf32>
    %c0_4 = arith.constant 0 : index
    %c0_5 = arith.constant 0 : index
    %11 = vector.load %arg6[%c0_4, %c0_5] : memref<8x128xf32, #tpu.memory_space<vmem>>, vector<8x128xf32>
    %c0_i32_6 = arith.constant 0 : i32
    %12 = arith.index_cast %c0_i32_6 : i32 to index
    %c0_7 = arith.constant 0 : index
    %c0_8 = arith.constant 0 : index
    %13 = vector.load %arg2[%12, %c0_7, %c0_8] : memref<4x8x128xf32, #tpu.memory_space<vmem>>, vector<1x8x128xf32>
    %14 = vector.shape_cast %13 : vector<1x8x128xf32> to vector<8x128xf32>
    %cst = arith.constant dense<0.000000e+00> : vector<8x128xf32>
    %15 = tpu.matmul %10, %3, %cst {dimension_numbers = #tpu.dot_dimension_numbers<[1], [0], [0], [1], [0, 0, 1, 1], [], []>} : vector<8x128xf32>, vector<128x128xf32>, vector<8x128xf32> -> vector<8x128xf32>
    %16 = arith.addf %14, %15 : vector<8x128xf32>
    %17 = arith.negf %16 : vector<8x128xf32>
    %18 = math.exp %17 : vector<8x128xf32>
    %cst_9 = arith.constant 1.000000e+00 : f32
    %19 = vector.broadcast %cst_9 : f32 to vector<8x128xf32>
    %20 = arith.addf %19, %18 : vector<8x128xf32>
    %21 = arith.divf %19, %20 : vector<8x128xf32>
    %22 = math.tanh %16 : vector<8x128xf32>
    %23 = arith.select %9, %22, %21 : vector<8x128xi1>, vector<8x128xf32>
    %c96_i32_10 = arith.constant 96 : i32
    %24 = tpu.dynamic_rotate %23 by %c96_i32_10 dim 1 : vector<8x128xf32>, i32 -> vector<8x128xf32>
    %c64_i32_11 = arith.constant 64 : i32
    %25 = tpu.dynamic_rotate %23 by %c64_i32_11 dim 1 : vector<8x128xf32>, i32 -> vector<8x128xf32>
    %c32_i32 = arith.constant 32 : i32
    %26 = tpu.dynamic_rotate %23 by %c32_i32 dim 1 : vector<8x128xf32>, i32 -> vector<8x128xf32>
    %27 = arith.mulf %24, %11 : vector<8x128xf32>
    %28 = arith.mulf %23, %25 : vector<8x128xf32>
    %29 = arith.addf %27, %28 : vector<8x128xf32>
    %30 = math.tanh %29 : vector<8x128xf32>
    %31 = arith.mulf %26, %30 : vector<8x128xf32>
    %c1_i32 = arith.constant 1 : i32
    %32 = arith.index_cast %c1_i32 : i32 to index
    %c0_12 = arith.constant 0 : index
    %c0_13 = arith.constant 0 : index
    %33 = vector.load %arg2[%32, %c0_12, %c0_13] : memref<4x8x128xf32, #tpu.memory_space<vmem>>, vector<1x8x128xf32>
    %34 = vector.shape_cast %33 : vector<1x8x128xf32> to vector<8x128xf32>
    %cst_14 = arith.constant dense<0.000000e+00> : vector<8x128xf32>
    %35 = tpu.matmul %31, %3, %cst_14 {dimension_numbers = #tpu.dot_dimension_numbers<[1], [0], [0], [1], [0, 0, 1, 1], [], []>} : vector<8x128xf32>, vector<128x128xf32>, vector<8x128xf32> -> vector<8x128xf32>
    %36 = arith.addf %34, %35 : vector<8x128xf32>
    %37 = arith.negf %36 : vector<8x128xf32>
    %38 = math.exp %37 : vector<8x128xf32>
    %cst_15 = arith.constant 1.000000e+00 : f32
    %39 = vector.broadcast %cst_15 : f32 to vector<8x128xf32>
    %40 = arith.addf %39, %38 : vector<8x128xf32>
    %41 = arith.divf %39, %40 : vector<8x128xf32>
    %42 = math.tanh %36 : vector<8x128xf32>
    %43 = arith.select %9, %42, %41 : vector<8x128xi1>, vector<8x128xf32>
    %c96_i32_16 = arith.constant 96 : i32
    %44 = tpu.dynamic_rotate %43 by %c96_i32_16 dim 1 : vector<8x128xf32>, i32 -> vector<8x128xf32>
    %c64_i32_17 = arith.constant 64 : i32
    %45 = tpu.dynamic_rotate %43 by %c64_i32_17 dim 1 : vector<8x128xf32>, i32 -> vector<8x128xf32>
    %c32_i32_18 = arith.constant 32 : i32
    %46 = tpu.dynamic_rotate %43 by %c32_i32_18 dim 1 : vector<8x128xf32>, i32 -> vector<8x128xf32>
    %47 = arith.mulf %44, %29 : vector<8x128xf32>
    %48 = arith.mulf %43, %45 : vector<8x128xf32>
    %49 = arith.addf %47, %48 : vector<8x128xf32>
    %50 = math.tanh %49 : vector<8x128xf32>
    %51 = arith.mulf %46, %50 : vector<8x128xf32>
    %c2_i32 = arith.constant 2 : i32
    %52 = arith.index_cast %c2_i32 : i32 to index
    %c0_19 = arith.constant 0 : index
    %c0_20 = arith.constant 0 : index
    %53 = vector.load %arg2[%52, %c0_19, %c0_20] : memref<4x8x128xf32, #tpu.memory_space<vmem>>, vector<1x8x128xf32>
    %54 = vector.shape_cast %53 : vector<1x8x128xf32> to vector<8x128xf32>
    %cst_21 = arith.constant dense<0.000000e+00> : vector<8x128xf32>
    %55 = tpu.matmul %51, %3, %cst_21 {dimension_numbers = #tpu.dot_dimension_numbers<[1], [0], [0], [1], [0, 0, 1, 1], [], []>} : vector<8x128xf32>, vector<128x128xf32>, vector<8x128xf32> -> vector<8x128xf32>
    %56 = arith.addf %54, %55 : vector<8x128xf32>
    %57 = arith.negf %56 : vector<8x128xf32>
    %58 = math.exp %57 : vector<8x128xf32>
    %cst_22 = arith.constant 1.000000e+00 : f32
    %59 = vector.broadcast %cst_22 : f32 to vector<8x128xf32>
    %60 = arith.addf %59, %58 : vector<8x128xf32>
    %61 = arith.divf %59, %60 : vector<8x128xf32>
    %62 = math.tanh %56 : vector<8x128xf32>
    %63 = arith.select %9, %62, %61 : vector<8x128xi1>, vector<8x128xf32>
    %c96_i32_23 = arith.constant 96 : i32
    %64 = tpu.dynamic_rotate %63 by %c96_i32_23 dim 1 : vector<8x128xf32>, i32 -> vector<8x128xf32>
    %c64_i32_24 = arith.constant 64 : i32
    %65 = tpu.dynamic_rotate %63 by %c64_i32_24 dim 1 : vector<8x128xf32>, i32 -> vector<8x128xf32>
    %c32_i32_25 = arith.constant 32 : i32
    %66 = tpu.dynamic_rotate %63 by %c32_i32_25 dim 1 : vector<8x128xf32>, i32 -> vector<8x128xf32>
    %67 = arith.mulf %64, %49 : vector<8x128xf32>
    %68 = arith.mulf %63, %65 : vector<8x128xf32>
    %69 = arith.addf %67, %68 : vector<8x128xf32>
    %70 = math.tanh %69 : vector<8x128xf32>
    %71 = arith.mulf %66, %70 : vector<8x128xf32>
    %c3_i32 = arith.constant 3 : i32
    %72 = arith.index_cast %c3_i32 : i32 to index
    %c0_26 = arith.constant 0 : index
    %c0_27 = arith.constant 0 : index
    %73 = vector.load %arg2[%72, %c0_26, %c0_27] : memref<4x8x128xf32, #tpu.memory_space<vmem>>, vector<1x8x128xf32>
    %74 = vector.shape_cast %73 : vector<1x8x128xf32> to vector<8x128xf32>
    %cst_28 = arith.constant dense<0.000000e+00> : vector<8x128xf32>
    %75 = tpu.matmul %71, %3, %cst_28 {dimension_numbers = #tpu.dot_dimension_numbers<[1], [0], [0], [1], [0, 0, 1, 1], [], []>} : vector<8x128xf32>, vector<128x128xf32>, vector<8x128xf32> -> vector<8x128xf32>
    %76 = arith.addf %74, %75 : vector<8x128xf32>
    %77 = arith.negf %76 : vector<8x128xf32>
    %78 = math.exp %77 : vector<8x128xf32>
    %cst_29 = arith.constant 1.000000e+00 : f32
    %79 = vector.broadcast %cst_29 : f32 to vector<8x128xf32>
    %80 = arith.addf %79, %78 : vector<8x128xf32>
    %81 = arith.divf %79, %80 : vector<8x128xf32>
    %82 = math.tanh %76 : vector<8x128xf32>
    %83 = arith.select %9, %82, %81 : vector<8x128xi1>, vector<8x128xf32>
    %c96_i32_30 = arith.constant 96 : i32
    %84 = tpu.dynamic_rotate %83 by %c96_i32_30 dim 1 : vector<8x128xf32>, i32 -> vector<8x128xf32>
    %c64_i32_31 = arith.constant 64 : i32
    %85 = tpu.dynamic_rotate %83 by %c64_i32_31 dim 1 : vector<8x128xf32>, i32 -> vector<8x128xf32>
    %c32_i32_32 = arith.constant 32 : i32
    %86 = tpu.dynamic_rotate %83 by %c32_i32_32 dim 1 : vector<8x128xf32>, i32 -> vector<8x128xf32>
    %87 = arith.mulf %84, %69 : vector<8x128xf32>
    %88 = arith.mulf %83, %85 : vector<8x128xf32>
    %89 = arith.addf %87, %88 : vector<8x128xf32>
    %90 = math.tanh %89 : vector<8x128xf32>
    %91 = arith.mulf %86, %90 : vector<8x128xf32>
    %c4_i32 = arith.constant 4 : i32
    %c0_33 = arith.constant 0 : index
    %c0_34 = arith.constant 0 : index
    %92 = vector.load %arg5[%c0_33, %c0_34] : memref<8x128xf32, #tpu.memory_space<vmem>>, vector<8x128xf32>
    tpu.vector_store %arg5[%c0_33, %c0_34], %91 {strides = array<i32>} : memref<8x128xf32, #tpu.memory_space<vmem>>, vector<8x128xf32>,
    %c0_35 = arith.constant 0 : index
    %c0_36 = arith.constant 0 : index
    %93 = vector.load %arg6[%c0_35, %c0_36] : memref<8x128xf32, #tpu.memory_space<vmem>>, vector<8x128xf32>
    tpu.vector_store %arg6[%c0_35, %c0_36], %89 {strides = array<i32>} : memref<8x128xf32, #tpu.memory_space<vmem>>, vector<8x128xf32>,
    %c1_i32_37 = arith.constant 1 : i32
    %94 = arith.cmpi eq, %arg1, %c1_i32_37 : i32
    %95 = arith.extui %94 : i1 to i32
    %c0_i32_38 = arith.constant 0 : i32
    %96 = arith.cmpi ne, %95, %c0_i32_38 : i32
    scf.if %96 {
      %c0_39 = arith.constant 0 : index
      %c0_40 = arith.constant 0 : index
      %97 = vector.load %arg4[%c0_39, %c0_40] : memref<8x128xf32, #tpu.memory_space<vmem>>, vector<8x128xf32>
      tpu.vector_store %arg4[%c0_39, %c0_40], %91 {strides = array<i32>} : memref<8x128xf32, #tpu.memory_space<vmem>>, vector<8x128xf32>,
    } else {
    }
    return
  }
  func.func @transform_0(%arg0: i32, %arg1: i32) -> (i32, i32, i32) {
    %c0_i32 = arith.constant 0 : i32
    %c0_i32_0 = arith.constant 0 : i32
    return %arg1, %arg0, %c0_i32 : i32, i32, i32
  }
  func.func @transform_1(%arg0: i32, %arg1: i32) -> (i32, i32) {
    %c0_i32 = arith.constant 0 : i32
    %c0_i32_0 = arith.constant 0 : i32
    %c0_i32_1 = arith.constant 0 : i32
    return %c0_i32, %c0_i32_0 : i32, i32
  }
  func.func @transform_2(%arg0: i32, %arg1: i32) -> (i32, i32) {
    %c0_i32 = arith.constant 0 : i32
    %c0_i32_0 = arith.constant 0 : i32
    return %arg0, %c0_i32 : i32, i32
  }
}

</mosaic_0001>

<bundles_post_ra>
// kernel: lstm_classifier_forward.1
= control target key start
LH: loop header
LB: loop body
LE: loop exit
PB: predicated region body
PF: predicated region fallthrough
CT: control target
= control target key end

     0   :  { %s1063_s9 = smov 0   ;;  %s1065_s10 = smov 0   ;;  %s1267_s0 = inlined_call_operand.vmem [shape: f32[8,8,128], index: 0, kind: input, shape index: {}]   ;;  %s1268_s1 = inlined_call_operand.vmem [shape: f32[128,128], index: 1, kind: input, shape index: {}]   ;;  %s1269_s2 = inlined_call_operand.vmem [shape: f32[8,128], index: 2, kind: output, shape index: {}]  }
   0x1   :  { %s1067_s11 = smov 0  }
   0x2 LB: > { %s21_s12 = sadd.s32 1, %s1035_s10  ;;  %p635_p0 = scmp.ge.s32.totalorder %s1039_s11, 1  ;;  %s1039_s11 = sphi %s1067_s11, %s12_s11   ;;  %s1035_s10 = sphi %s1065_s10, %s1273_s10   ;;  %s1031_s9 = sphi %s1063_s9, %s1272_s9  }
   0x3   : > { %p22_p1 = scmp.ge.s32.totalorder %s21_s12, 2  ;;  %p130_p2 = scmp.lt.s32.totalorder %s1039_s11, 3 }
   0x5   : > { %s1275_s12 = smov (%p22_p1, %s21_s12), 0  ;;  %p131_p3 = pnand %p635_p0, %p130_p2 }
   0x6   : > { %s636_s13 = sshll.u32 (!%p131_p3), %s1031_s9, 2  ;;  %p638_p5 = scmp.ne.s32.totalorder (!%p131_p3), %s1031_s9, 0 }
   0x7   : > { %134 = sbr.rel (%p131_p3) target bundleno = 1552 (0x610), region = 28  ;;  %p155_p4 = scmp.lt.s32.totalorder (!%p131_p3), %s636_s13, 7 }
   0xe   : > { %s1277_s13 = smov (!%p155_p4, %s636_s13), 7  ;;  %170 = sbr.rel (%p638_p5) target bundleno = 21 (0x15), region = 32 }
   0xf   : > { %s637_s14 = sshll.u32 %s1277_s13, 3  ;;  %v1041_v0 = vmov (!%p638_p5), 0.0  }
  0x10   : > { %s1087_s17 = scalar_lea.vmem %s1267_s0, %s637_s14  ;;  %171 = vst [vmem:[#allocation2] sm:$0xff] (!%p638_p5), %v1041_v0  ;;  %172 = vst [vmem:[#allocation3] sm:$0xff] (!%p638_p5), %v1041_v0 }
  0x15 PF: > { %v173_v1 = vld [vmem:[%s1268_s1] sm:$0xff]  ;;  %v174_v2 = vld [vmem:[%s1268_s1 + $0x8] sm:$0xff]  ;;  %v175_v3 = vld [vmem:[%s1268_s1 + $0x10] sm:$0xff]  ;;  %v1042_v4 = vmov 0.0|0.0   ;;  %vm1043_vm0 = vmmov 0   ;;  %v1044_v7 = vmov 0.0   ;;  %v189_v34 = vlaneseq }
  0x16   : > { %858 = vmatprep.subr.bf16.mxu0 %v1042_v4  ;;  %v1100_v5 = vpack.c.bf16 %v174_v2, %v173_v1  ;;  %v176_v6 = vld [vmem:[%s1268_s1 + $0x18] sm:$0xff]  ;;  %750 = vmatprep.mubr.msk.f32.mxu0 %vm1043_vm0, %v1044_v7  ;;  %v177_v9 = vld [vmem:[%s1268_s1 + $0x20] sm:$0xff]  ;;  %v178_v10 = vld [vmem:[%s1268_s1 + $0x28] sm:$0xff]  ;;  %s1045_s27 = smov 32   ;;  %s1046_s28 = smov 96  }
  0x17   : > { %882 = vmatprep.subr.bf16.mxu1 %v1042_v4  ;;  %785 = vmatprep.mubr.msk.f32.mxu1 %vm1043_vm0, %v1044_v7  ;;  %v1111_v8 = vpack.c.bf16 %v176_v6, %v175_v3  ;;  %v1123_v11 = vpack.c.bf16 %v178_v10, %v177_v9  ;;  %v179_v12 = vld [vmem:[%s1268_s1 + $0x30] sm:$0xff]  ;;  %v180_v13 = vld [vmem:[%s1268_s1 + $0x38] sm:$0xff]  ;;  %v181_v15 = vld [vmem:[%s1268_s1 + $0x40] sm:$0xff]  ;;  %v190_v36 = vand.u32 127, %v189_v34  ;;  %s1047_s29 = smov 64   ;;  %p646_p6 = scmp.ne.s32.totalorder %s1031_s9, 1 }
  0x18   : > { %860 = vmatpush3.bf16.msra.mxu0 %v1100_v5  ;;  %884 = vmatpush3.bf16.msra.mxu1 %v1100_v5  ;;  %v1135_v14 = vpack.c.bf16 %v180_v13, %v179_v12  ;;  %v182_v16 = vld [vmem:[%s1268_s1 + $0x48] sm:$0xff]  ;;  %v183_v18 = vld [vmem:[%s1268_s1 + $0x50] sm:$0xff]  ;;  %v184_v19 = vld [vmem:[%s1268_s1 + $0x58] sm:$0xff] }
  0x19   : > { %861 = vmatprep.subr.bf16.mxu0 %v1042_v4  ;;  %885 = vmatprep.subr.bf16.mxu1 %v1042_v4  ;;  %v1147_v17 = vpack.c.bf16 %v182_v16, %v181_v15  ;;  %v1159_v20 = vpack.c.bf16 %v184_v19, %v183_v18  ;;  %v185_v21 = vld [vmem:[%s1268_s1 + $0x60] sm:$0xff]  ;;  %v186_v22 = vld [vmem:[%s1268_s1 + $0x68] sm:$0xff]  ;;  %v187_v24 = vld [vmem:[%s1268_s1 + $0x70] sm:$0xff]  ;;  %vm191_vm1 = vcmp.ge.s32.totalorder %v190_v36, 64  ;;  %vm192_vm2 = vcmp.lt.s32.totalorder %v190_v36, 96 }
  0x1a   : > { %v1171_v23 = vpack.c.bf16 %v186_v22, %v185_v21  ;;  %v188_v25 = vld [vmem:[%s1268_s1 + $0x78] sm:$0xff]  ;;  %v194_v27 = vld [vmem:[#allocation2] sm:$0xff]  ;;  %vm1210_vm3 = vmand %vm191_vm1, %vm192_vm2 }
  0x1b   : > { %v1183_v26 = vpack.c.bf16 %v188_v25, %v187_v24  ;;  %v196_v28 = vld [vmem:[%s1087_s17] sm:$0xff]  ;;  %v195_v42 = vld [vmem:[#allocation3] sm:$0xff]  ;;  %v644_v22 = vld [vmem:[%s1087_s17 + $0x18] sm:$0xff] }
  0x1c   : > { %863 = vmatpush3.bf16.msra.mxu0 %v1111_v8  ;;  %887 = vmatpush3.bf16.msra.mxu1 %v1111_v8  ;;  %v640_v50 = vld [vmem:[%s1087_s17 + $0x8] sm:$0xff] }
  0x1d   : > { %864 = vmatprep.subr.bf16.mxu0 %v1042_v4  ;;  %888 = vmatprep.subr.bf16.mxu1 %v1042_v4 }
  0x20   : > { %866 = vmatpush3.bf16.msra.mxu0 %v1123_v11  ;;  %890 = vmatpush3.bf16.msra.mxu1 %v1123_v11 }
  0x21   : > { %867 = vmatprep.subr.bf16.mxu0 %v1042_v4  ;;  %891 = vmatprep.subr.bf16.mxu1 %v1042_v4 }
  0x24   : > { %869 = vmatpush3.bf16.msra.mxu0 %v1135_v14  ;;  %893 = vmatpush3.bf16.msra.mxu1 %v1135_v14 }
  0x25   : > { %870 = vmatprep.subr.bf16.mxu0 %v1042_v4  ;;  %894 = vmatprep.subr.bf16.mxu1 %v1042_v4 }
  0x28   : > { %872 = vmatpush3.bf16.msra.mxu0 %v1147_v17  ;;  %896 = vmatpush3.bf16.msra.mxu1 %v1147_v17 }
  0x29   : > { %873 = vmatprep.subr.bf16.mxu0 %v1042_v4  ;;  %897 = vmatprep.subr.bf16.mxu1 %v1042_v4 }
  0x2c   : > { %875 = vmatpush3.bf16.msra.mxu0 %v1159_v20  ;;  %899 = vmatpush3.bf16.msra.mxu1 %v1159_v20 }
  0x2d   : > { %876 = vmatprep.subr.bf16.mxu0 %v1042_v4  ;;  %900 = vmatprep.subr.bf16.mxu1 %v1042_v4 }
  0x30   : > { %878 = vmatpush3.bf16.msra.mxu0 %v1171_v23  ;;  %902 = vmatpush3.bf16.msra.mxu1 %v1171_v23 }
  0x31   : > { %879 = vmatprep.subr.bf16.mxu0 %v1042_v4  ;;  %903 = vmatprep.subr.bf16.mxu1 %v1042_v4 }
  0x34   : > { %881 = vmatpush3.bf16.msra.mxu0 %v1183_v26  ;;  %905 = vmatpush3.bf16.msra.mxu1 %v1183_v26 }
  0x35   : > { %906 = vmatprep.subr.bf16.mxu0 %v1042_v4  ;;  %930 = vmatprep.subr.bf16.mxu1 %v1042_v4 }
  0x37   : > { %751 = vmatmul.mubr.f32.vlgmr.msra.gmra.mrb[0].mxu0 %v194_v27 }
  0x38   : > { %908 = vmatpush3.bf16.msra.mxu0 %v1100_v5  ;;  %820 = vmatprep.mubr.msk.f32.mxu0 %vm1043_vm0, %v1044_v7 }
  0x39   : > { %909 = vmatprep.subr.bf16.mxu0 %v1042_v4 }
  0x3c   : > { %911 = vmatpush3.bf16.msra.mxu0 %v1111_v8 }
  0x3d   : > { %912 = vmatprep.subr.bf16.mxu0 %v1042_v4 }
  0x40   : > { %914 = vmatpush3.bf16.msra.mxu0 %v1123_v11 }
  0x41   : > { %915 = vmatprep.subr.bf16.mxu0 %v1042_v4 }
  0x44   : > { %917 = vmatpush3.bf16.msra.mxu0 %v1135_v14 }
  0x45   : > { %918 = vmatprep.subr.bf16.mxu0 %v1042_v4 }
  0x48   : > { %920 = vmatpush3.bf16.msra.mxu0 %v1147_v17 }
  0x49   : > { %921 = vmatprep.subr.bf16.mxu0 %v1042_v4 }
  0x4c   : > { %923 = vmatpush3.bf16.msra.mxu0 %v1159_v20 }
  0x4d   : > { %924 = vmatprep.subr.bf16.mxu0 %v1042_v4 }
  0x50   : > { %926 = vmatpush3.bf16.msra.mxu0 %v1171_v23 }
  0x51   : > { %927 = vmatprep.subr.bf16.mxu0 %v1042_v4 }
  0x54   : > { %929 = vmatpush3.bf16.msra.mxu0 %v1183_v26 }
 0x10a   : > { %v263_v29 = vpop.f32.mrb[0].mxu0 }
 0x10b   : > { %v267_v30 = vadd.f32 %v263_v29, %v196_v28  ;;  %v752_v31 = vpop.f32.mrb[1].mxu0 }
 0x10d   : > { %v639_v32 = vmul.f32 -1.442695, %v267_v30 }
 0x10f   : > { %985 = vpow2.f32 %v639_v32 }
 0x110   : > { %987 = vtanh.f32 %v267_v30 }
 0x119   : > { %v986_v33 = vpop.eup %985 }
 0x11a   : > { %v271_v35 = vadd.f32 1.0, %v986_v33  ;;  %v988_v38 = vpop.eup %987 }
 0x11c   : > { %989 = vrcp.f32 %v271_v35 }
 0x126   : > { %v990_v39 = vpop.eup %989 }
 0x127   : > { %v275_v40 = vsel %vm1210_vm3, %v988_v38, %v990_v39 }
 0x128   : > { %280 = vrot.lane.b32.xlu1 %v275_v40, %s1045_s27  ;;  %276 = vrot.lane.b32.xlu0 %v275_v40, %s1046_s28 }
 0x12c   : > { %278 = vrot.lane.b32.xlu0 %v275_v40, %s1047_s29 }
 0x19a   : > { %v277_v41 = vpop.permute.xlu0 %276  ;;  %v281_v48 = vpop.permute.xlu1 %280 }
 0x19b   : > { %v282_v44 = vmul.f32 %v277_v41, %v195_v42 }
 0x19e   : > { %v279_v43 = vpop.permute.xlu0 %278 }
 0x19f   : > { %v283_v45 = vmul.f32 %v279_v43, %v275_v40 }
 0x1a1   : > { %v284_v46 = vadd.f32 %v283_v45, %v282_v44 }
 0x1a3   : > { %991 = vtanh.f32 %v284_v46 }
 0x1ad   : > { %v992_v47 = vpop.eup %991 }
 0x1ae   : > { %v286_v49 = vmul.f32 %v992_v47, %v281_v48 }
 0x1b0   : > { %786 = vmatmul.mubr.f32.vlgmr.msra.gmra.mrb[0].mxu1 %v286_v49 }
 0x1b1   : > { %932 = vmatpush3.bf16.msra.mxu1 %v1100_v5  ;;  %855 = vmatprep.mubr.msk.f32.mxu1 %vm1043_vm0, %v1044_v7 }
 0x1b2   : > { %933 = vmatprep.subr.bf16.mxu1 %v1042_v4 }
 0x1b5   : > { %935 = vmatpush3.bf16.msra.mxu1 %v1111_v8 }
 0x1b6   : > { %936 = vmatprep.subr.bf16.mxu1 %v1042_v4 }
 0x1b9   : > { %938 = vmatpush3.bf16.msra.mxu1 %v1123_v11 }
 0x1ba   : > { %939 = vmatprep.subr.bf16.mxu1 %v1042_v4 }
 0x1bd   : > { %941 = vmatpush3.bf16.msra.mxu1 %v1135_v14 }
 0x1be   : > { %942 = vmatprep.subr.bf16.mxu1 %v1042_v4 }
 0x1c1   : > { %944 = vmatpush3.bf16.msra.mxu1 %v1147_v17 }
 0x1c2   : > { %945 = vmatprep.subr.bf16.mxu1 %v1042_v4 }
 0x1c5   : > { %947 = vmatpush3.bf16.msra.mxu1 %v1159_v20 }
 0x1c6   : > { %948 = vmatprep.subr.bf16.mxu1 %v1042_v4 }
 0x1c9   : > { %950 = vmatpush3.bf16.msra.mxu1 %v1171_v23 }
 0x1ca   : > { %951 = vmatprep.subr.bf16.mxu1 %v1042_v4  ;;  %v642_v4 = vld [vmem:[%s1087_s17 + $0x10] sm:$0xff] }
 0x1cd   : > { %953 = vmatpush3.bf16.msra.mxu1 %v1183_v26 }
 0x283   : > { %v355_v51 = vpop.f32.mrb[0].mxu1 }
 0x284   : > { %v359_v52 = vadd.f32 %v640_v50, %v355_v51  ;;  %v787_v53 = vpop.f32.mrb[1].mxu1 }
 0x286   : > { %v641_v54 = vmul.f32 -1.442695, %v359_v52 }
 0x288   : > { %993 = vpow2.f32 %v641_v54 }
 0x289   : > { %995 = vtanh.f32 %v359_v52 }
 0x292   : > { %v994_v55 = vpop.eup %993 }
 0x293   : > { %v363_v56 = vadd.f32 1.0, %v994_v55  ;;  %v996_v57 = vpop.eup %995 }
 0x295   : > { %997 = vrcp.f32 %v363_v56 }
 0x29f   : > { %v998_v58 = vpop.eup %997 }
 0x2a0   : > { %v367_v59 = vsel %vm1210_vm3, %v996_v57, %v998_v58 }
 0x2a1   : > { %370 = vrot.lane.b32.xlu0 %v367_v59, %s1047_s29  ;;  %368 = vrot.lane.b32.xlu1 %v367_v59, %s1046_s28 }
 0x2a5   : > { %372 = vrot.lane.b32.xlu1 %v367_v59, %s1045_s27 }
 0x313   : > { %v371_v60 = vpop.permute.xlu0 %370  ;;  %v369_v61 = vpop.permute.xlu1 %368 }
 0x314   : > { %v375_v62 = vmul.f32 %v371_v60, %v367_v59  ;;  %v374_v63 = vmul.f32 %v369_v61, %v284_v46 }
 0x316   : > { %v376_v0 = vadd.f32 %v375_v62, %v374_v63 }
 0x317   : > { %v373_v2 = vpop.permute.xlu1 %372 }
 0x318   : > { %999 = vtanh.f32 %v376_v0 }
 0x322   : > { %v1000_v1 = vpop.eup %999 }
 0x323   : > { %v378_v3 = vmul.f32 %v1000_v1, %v373_v2 }
 0x325   : > { %821 = vmatmul.mubr.f32.vlgmr.msra.gmra.mrb[2].mxu0 %v378_v3 }
 0x3f8   : > { %v447_v5 = vpop.f32.mrb[2].mxu0 }
 0x3f9   : > { %v451_v6 = vadd.f32 %v642_v4, %v447_v5  ;;  %v822_v7 = vpop.f32.mrb[3].mxu0 }
 0x3fb   : > { %v643_v8 = vmul.f32 -1.442695, %v451_v6 }
 0x3fd   : > { %1001 = vpow2.f32 %v643_v8 }
 0x3fe   : > { %1003 = vtanh.f32 %v451_v6 }
 0x407   : > { %v1002_v9 = vpop.eup %1001 }
 0x408   : > { %v455_v10 = vadd.f32 1.0, %v1002_v9  ;;  %v1004_v11 = vpop.eup %1003 }
 0x40a   : > { %1005 = vrcp.f32 %v455_v10 }
 0x414   : > { %v1006_v12 = vpop.eup %1005 }
 0x415   : > { %v459_v13 = vsel %vm1210_vm3, %v1004_v11, %v1006_v12 }
 0x416   : > { %462 = vrot.lane.b32.xlu1 %v459_v13, %s1047_s29  ;;  %460 = vrot.lane.b32.xlu0 %v459_v13, %s1046_s28 }
 0x41a   : > { %464 = vrot.lane.b32.xlu0 %v459_v13, %s1045_s27 }
 0x488   : > { %v463_v14 = vpop.permute.xlu1 %462  ;;  %v461_v15 = vpop.permute.xlu0 %460 }
 0x489   : > { %v467_v16 = vmul.f32 %v463_v14, %v459_v13  ;;  %v466_v17 = vmul.f32 %v461_v15, %v376_v0 }
 0x48b   : > { %v468_v18 = vadd.f32 %v467_v16, %v466_v17 }
 0x48c   : > { %v465_v20 = vpop.permute.xlu0 %464 }
 0x48d   : > { %1007 = vtanh.f32 %v468_v18 }
 0x497   : > { %v1008_v19 = vpop.eup %1007 }
 0x498   : > { %v470_v21 = vmul.f32 %v1008_v19, %v465_v20 }
 0x49a   : > { %856 = vmatmul.mubr.f32.vlgmr.msra.gmra.mrb[2].mxu1 %v470_v21 }
 0x56d   : > { %v539_v23 = vpop.f32.mrb[2].mxu1 }
 0x56e   : > { %v543_v24 = vadd.f32 %v644_v22, %v539_v23  ;;  %v857_v25 = vpop.f32.mrb[3].mxu1 }
 0x570   : > { %v645_v26 = vmul.f32 -1.442695, %v543_v24 }
 0x572   : > { %1009 = vpow2.f32 %v645_v26 }
 0x573   : > { %1011 = vtanh.f32 %v543_v24 }
 0x57c   : > { %v1010_v27 = vpop.eup %1009 }
 0x57d   : > { %v547_v28 = vadd.f32 1.0, %v1010_v27  ;;  %v1012_v29 = vpop.eup %1011 }
 0x57f   : > { %1013 = vrcp.f32 %v547_v28 }
 0x589   : > { %v1014_v30 = vpop.eup %1013 }
 0x58a   : > { %v551_v31 = vsel %vm1210_vm3, %v1012_v29, %v1014_v30 }
 0x58b   : > { %554 = vrot.lane.b32.xlu0 %v551_v31, %s1047_s29  ;;  %552 = vrot.lane.b32.xlu1 %v551_v31, %s1046_s28 }
 0x58f   : > { %556 = vrot.lane.b32.xlu1 %v551_v31, %s1045_s27 }
 0x5fd   : > { %v555_v32 = vpop.permute.xlu0 %554  ;;  %v553_v33 = vpop.permute.xlu1 %552 }
 0x5fe   : > { %v559_v34 = vmul.f32 %v555_v32, %v551_v31  ;;  %v558_v35 = vmul.f32 %v553_v33, %v468_v18 }
 0x600   : > { %v560_v36 = vadd.f32 %v559_v34, %v558_v35 }
 0x601   : > { %v557_v39 = vpop.permute.xlu1 %556 }
 0x602   : > { %1015 = vtanh.f32 %v560_v36  ;;  %564 = vst [vmem:[#allocation3] sm:$0xff] %v560_v36 }
 0x609   : > { %568 = sbr.rel (%p646_p6) target bundleno = 1552 (0x610), region = 36 }
 0x60c   : > { %v1016_v38 = vpop.eup %1015 }
 0x60d   : > { %v562_v40 = vmul.f32 %v1016_v38, %v557_v39 }
 0x60f   : > { %563 = vst [vmem:[#allocation2] sm:$0xff] %v562_v40  ;;  %569 = vst [vmem:[%s1269_s2] sm:$0xff] (!%p646_p6), %v562_v40 }
 0x610 PF: > { %s12_s11 = sadd.s32 1, %s1039_s11   ;;  %s1272_s9 = smov %s1035_s10 }
 0x611   : > { %p9_p7 = scmp.ge.s32.totalorder %s12_s11, 4   ;;  %s1273_s10 = smov %s1275_s12 }
 0x613   :  { %11 = sbr.rel (!%p9_p7) target bundleno = 2 (0x2), region = 69 }

</bundles_post_ra>
